<compile_context>
chip_gen: v6e
topology: v6e:2x2x1
jax: 0.10.0
libtpu: 0.0.40
codegen_flags: <defaults>
</compile_context>

<pallas_src>
import functools

import jax
import jax.numpy as jnp
from jax.experimental import pallas as pl
from jax.experimental.pallas import tpu as pltpu


def _round_up(x, m):
    return ((x + m - 1) // m) * m


def _silu(x):
    # SiLU / swish activation (NewtonNet's default activation).
    return x * jax.nn.sigmoid(x)


def _charge_mlp_kernel(x_ref, w1_ref, b1_ref, w2_ref, b2_ref, w3_ref, b3_ref, o_ref):
    """Fused 3-layer MLP on one row tile: (T,F) -> (T,F) -> (T,F) -> (T,1).

    x / w1 / w2 / w3 may be bf16 (MXU-native); biases and all accumulation are f32.
    """
    x = x_ref[...]                                                       # (T, F)

    h1 = jnp.dot(x, w1_ref[...], preferred_element_type=jnp.float32)     # MXU, f32 acc
    h1 = _silu(h1 + b1_ref[...])                                         # VPU/EUP in f32

    h2 = jnp.dot(h1.astype(w2_ref.dtype), w2_ref[...],
                 preferred_element_type=jnp.float32)                     # MXU, f32 acc
    h2 = _silu(h2 + b2_ref[...])

    # Third layer has output width 1 -> avoid a degenerate MXU matmul; use a
    # VPU multiply + lane reduction against the (1, F) weight row instead.
    w3_row = w3_ref[...].astype(jnp.float32)                             # (1, F)
    h3 = jnp.sum(h2 * w3_row, axis=-1, keepdims=True)                    # (T, 1)

    o_ref[...] = (h3 + b3_ref[0]).astype(o_ref.dtype)                    # b3 scalar (SMEM)


@functools.partial(jax.jit, static_argnames=("tile_n", "use_bf16"))
def charge_output(atom_node, w1, b1, w2, b2, w3, b3, *, tile_n=1024, use_bf16=True):
    """atom_node: (B, A, F) float32.  Returns charge: (B, A, 1) float32."""
    B, A, F = atom_node.shape
    N = B * A
    compute_dtype = jnp.bfloat16 if use_bf16 else jnp.float32

    # Row tile: as large as requested, multiple of 8 (sublanes), never larger than needed.
    tile_n = min(int(tile_n), _round_up(N, 8))
    n_pad = _round_up(N, tile_n)
    grid = (n_pad // tile_n,)

    x = atom_node.reshape(N, F).astype(compute_dtype)
    if n_pad != N:
        x = jnp.pad(x, ((0, n_pad - N), (0, 0)))

    # Weights stored (in_features, out_features): kernel computes x @ W + b.
    w1c = w1.astype(compute_dtype)
    w2c = w2.astype(compute_dtype)
    w3_row = w3.reshape(1, F).astype(compute_dtype)       # (F,1) -> (1,F) row
    b1_2d = b1.reshape(1, F).astype(jnp.float32)
    b2_2d = b2.reshape(1, F).astype(jnp.float32)
    b3_1d = b3.reshape(1).astype(jnp.float32)             # scalar, goes to SMEM

    # Explicit VMEM budget: double-buffered x/out tiles + resident weights + f32 intermediates.
    itemsize = jnp.dtype(compute_dtype).itemsize
    vmem_bytes = (
        2 * tile_n * F * itemsize        # x tiles (double-buffered)
        + 2 * tile_n * 4                 # out tiles (double-buffered)
        + 2 * (2 * F * F + F) * itemsize  # w1, w2, w3 row (conservatively x2)
        + 2 * 2 * F * 4                  # b1, b2
        + 2 * tile_n * F * 4             # h1 / h2 f32 intermediates
    )
    vmem_limit = int(min(max(2 * vmem_bytes, 16 << 20), 48 << 20))

    resident = lambda shape: pl.BlockSpec(shape, lambda i: (0, 0))

    out = pl.pallas_call(
        _charge_mlp_kernel,
        out_shape=jax.ShapeDtypeStruct((n_pad, 1), jnp.float32),
        grid_spec=pltpu.PrefetchScalarGridSpec(
            num_scalar_prefetch=0,
            grid=grid,
            in_specs=[
                pl.BlockSpec((tile_n, F), lambda i: (i, 0)),          # x: streamed row tiles
                resident((F, F)),                                      # w1 (VMEM-resident)
                resident((1, F)),                                      # b1
                resident((F, F)),                                      # w2
                resident((1, F)),                                      # b2
                resident((1, F)),                                      # w3 row
                pl.BlockSpec(memory_space=pltpu.MemorySpace.SMEM),     # b3 scalar
            ],
            out_specs=pl.BlockSpec((tile_n, 1), lambda i: (i, 0)),
        ),
        compiler_params=pltpu.CompilerParams(
            dimension_semantics=("parallel",),     # megacore sharding on v7x; no-op on v5e/v6e
            vmem_limit_bytes=vmem_limit,
        ),
    )(x, w1c, b1_2d, w2c, b2_2d, w3_row, b3_1d)

    return out[:N].reshape(B, A, 1)


def init_params(key, n_features):
    """Deterministic init mimicking nn.Linear (uniform(-1/sqrt(fan_in), 1/sqrt(fan_in))).

    Weights are stored (in_features, out_features) for direct x @ W use in-kernel.
    """
    k = jax.random.split(key, 6)
    bound = 1.0 / jnp.sqrt(jnp.float32(n_features))
    w1 = jax.random.uniform(k[0], (n_features, n_features), jnp.float32, -bound, bound)
    b1 = jax.random.uniform(k[1], (n_features,), jnp.float32, -bound, bound)
    w2 = jax.random.uniform(k[2], (n_features, n_features), jnp.float32, -bound, bound)
    b2 = jax.random.uniform(k[3], (n_features,), jnp.float32, -bound, bound)
    w3 = jax.random.uniform(k[4], (n_features, 1), jnp.float32, -bound, bound)
    b3 = jax.random.uniform(k[5], (1,), jnp.float32, -bound, bound)
    return w1, b1, w2, b2, w3, b3


def reference_forward(atom_node, w1, b1, w2, b2, w3, b3, compute_dtype=jnp.float32):
    """Pure-JAX reference with the same boundary casts as the kernel."""
    cd = compute_dtype
    h1 = jnp.dot(atom_node.astype(cd), w1.astype(cd),
                 preferred_element_type=jnp.float32) + b1
    h1 = _silu(h1)
    h2 = jnp.dot(h1.astype(cd), w2.astype(cd),
                 preferred_element_type=jnp.float32) + b2
    h2 = _silu(h2)
    w3_row = w3.reshape(1, -1).astype(cd).astype(jnp.float32)
    return jnp.sum(h2 * w3_row, axis=-1, keepdims=True) + b3


if __name__ == "__main__":
    key = jax.random.PRNGKey(0)
    k_x, k_p = jax.random.split(key)

    batch, n_atoms, n_features = 2, 8, 32
    atom_node = jax.random.normal(k_x, (batch, n_atoms, n_features), jnp.float32)
    params = init_params(k_p, n_features)

    # Default (bf16 inputs/weights, f32 accumulation) path.
    charge_bf16 = jax.block_until_ready(charge_output(atom_node, *params))
    ref_bf16 = reference_forward(atom_node, *params, compute_dtype=jnp.bfloat16)
    assert charge_bf16.shape == (batch, n_atoms, 1)
    assert jnp.allclose(charge_bf16, ref_bf16, atol=5e-3, rtol=5e-3), "bf16 path mismatch"

    # Full-precision path matches the PyTorch f32 module tightly.
    charge_f32 = jax.block_until_ready(charge_output(atom_node, *params, use_bf16=False))
    ref_f32 = reference_forward(atom_node, *params, compute_dtype=jnp.float32)
    assert charge_f32.shape == (batch, n_atoms, 1)
    assert jnp.allclose(charge_f32, ref_f32, atol=1e-5, rtol=1e-5), "f32 path mismatch"

    print("KERNEL_OK")
</pallas_src>

<mosaic_0001>
module attributes {stable_mosaic.version = 11 : i64} {
  func.func @_charge_mlp_kernel(%arg0: i32, %arg1: memref<16x32xbf16, #tpu.memory_space<vmem>>, %arg2: memref<32x32xbf16, #tpu.memory_space<vmem>>, %arg3: memref<1x32xf32, #tpu.memory_space<vmem>>, %arg4: memref<32x32xbf16, #tpu.memory_space<vmem>>, %arg5: memref<1x32xf32, #tpu.memory_space<vmem>>, %arg6: memref<1x32xbf16, #tpu.memory_space<vmem>>, %arg7: memref<1xf32, #tpu.memory_space<smem>>, %arg8: memref<16x1xf32, #tpu.memory_space<vmem>>) attributes {dimension_semantics = [#tpu.dimension_semantics<parallel>], iteration_bounds = array<i64: 1>, scalar_prefetch = 0 : i64, scratch_operands = 0 : i64, tpu.core_type = #tpu.core_type<tc>, window_params = [{transform_indices = @transform_0, window_bounds = array<i64: 16, 32>}, {pipeline_mode = #tpu.pipeline_mode<synchronous>, transform_indices = @transform_1, window_bounds = array<i64: 32, 32>}, {pipeline_mode = #tpu.pipeline_mode<synchronous>, transform_indices = @transform_2, window_bounds = array<i64: 1, 32>}, {pipeline_mode = #tpu.pipeline_mode<synchronous>, transform_indices = @transform_3, window_bounds = array<i64: 32, 32>}, {pipeline_mode = #tpu.pipeline_mode<synchronous>, transform_indices = @transform_4, window_bounds = array<i64: 1, 32>}, {pipeline_mode = #tpu.pipeline_mode<synchronous>, transform_indices = @transform_5, window_bounds = array<i64: 1, 32>}, {transform_indices = @transform_6, window_bounds = array<i64: 1>}, {transform_indices = @transform_7, window_bounds = array<i64: 16, 1>}]} {
    %c0 = arith.constant 0 : index
    %c0_0 = arith.constant 0 : index
    %0 = vector.load %arg1[%c0, %c0_0] : memref<16x32xbf16, #tpu.memory_space<vmem>>, vector<16x32xbf16>
    %c0_1 = arith.constant 0 : index
    %c0_2 = arith.constant 0 : index
    %1 = vector.load %arg2[%c0_1, %c0_2] : memref<32x32xbf16, #tpu.memory_space<vmem>>, vector<32x32xbf16>
    %cst = arith.constant dense<0.000000e+00> : vector<16x32xf32>
    %2 = tpu.matmul %0, %1, %cst {dimension_numbers = #tpu.dot_dimension_numbers<[1], [0], [0], [1], [0, 0, 1, 1], [], []>} : vector<16x32xbf16>, vector<32x32xbf16>, vector<16x32xf32> -> vector<16x32xf32>
    %c0_3 = arith.constant 0 : index
    %c0_4 = arith.constant 0 : index
    %3 = vector.load %arg3[%c0_3, %c0_4] : memref<1x32xf32, #tpu.memory_space<vmem>>, vector<1x32xf32>
    %4 = vector.broadcast %3 : vector<1x32xf32> to vector<16x32xf32>
    %5 = arith.addf %2, %4 : vector<16x32xf32>
    %6 = arith.negf %5 : vector<16x32xf32>
    %7 = math.exp %6 : vector<16x32xf32>
    %cst_5 = arith.constant 1.000000e+00 : f32
    %8 = vector.broadcast %cst_5 : f32 to vector<16x32xf32>
    %9 = arith.addf %8, %7 : vector<16x32xf32>
    %10 = arith.divf %8, %9 : vector<16x32xf32>
    %11 = arith.mulf %5, %10 : vector<16x32xf32>
    %12 = arith.truncf %11 : vector<16x32xf32> to vector<16x32xbf16>
    %c0_6 = arith.constant 0 : index
    %c0_7 = arith.constant 0 : index
    %13 = vector.load %arg4[%c0_6, %c0_7] : memref<32x32xbf16, #tpu.memory_space<vmem>>, vector<32x32xbf16>
    %cst_8 = arith.constant dense<0.000000e+00> : vector<16x32xf32>
    %14 = tpu.matmul %12, %13, %cst_8 {dimension_numbers = #tpu.dot_dimension_numbers<[1], [0], [0], [1], [0, 0, 1, 1], [], []>} : vector<16x32xbf16>, vector<32x32xbf16>, vector<16x32xf32> -> vector<16x32xf32>
    %c0_9 = arith.constant 0 : index
    %c0_10 = arith.constant 0 : index
    %15 = vector.load %arg5[%c0_9, %c0_10] : memref<1x32xf32, #tpu.memory_space<vmem>>, vector<1x32xf32>
    %16 = vector.broadcast %15 : vector<1x32xf32> to vector<16x32xf32>
    %17 = arith.addf %14, %16 : vector<16x32xf32>
    %18 = arith.negf %17 : vector<16x32xf32>
    %19 = math.exp %18 : vector<16x32xf32>
    %cst_11 = arith.constant 1.000000e+00 : f32
    %20 = vector.broadcast %cst_11 : f32 to vector<16x32xf32>
    %21 = arith.addf %20, %19 : vector<16x32xf32>
    %22 = arith.divf %20, %21 : vector<16x32xf32>
    %23 = arith.mulf %17, %22 : vector<16x32xf32>
    %c0_12 = arith.constant 0 : index
    %c0_13 = arith.constant 0 : index
    %24 = vector.load %arg6[%c0_12, %c0_13] : memref<1x32xbf16, #tpu.memory_space<vmem>>, vector<1x32xbf16>
    %25 = arith.extf %24 : vector<1x32xbf16> to vector<1x32xf32>
    %26 = vector.broadcast %25 : vector<1x32xf32> to vector<16x32xf32>
    %27 = arith.mulf %23, %26 : vector<16x32xf32>
    %cst_14 = arith.constant dense<0.000000e+00> : vector<16xf32>
    %28 = vector.multi_reduction <add>, %27, %cst_14 [1] : vector<16x32xf32> to vector<16xf32>
    %29 = vector.shape_cast %28 : vector<16xf32> to vector<16x1xf32>
    %c0_15 = arith.constant 0 : index
    %30 = memref.load %arg7[%c0_15] : memref<1xf32, #tpu.memory_space<smem>>
    %31 = vector.broadcast %30 : f32 to vector<16x1xf32>
    %32 = arith.addf %29, %31 : vector<16x1xf32>
    %c0_16 = arith.constant 0 : index
    %c0_17 = arith.constant 0 : index
    %33 = vector.load %arg8[%c0_16, %c0_17] : memref<16x1xf32, #tpu.memory_space<vmem>>, vector<16x1xf32>
    tpu.vector_store %arg8[%c0_16, %c0_17], %32 {strides = array<i32>} : memref<16x1xf32, #tpu.memory_space<vmem>>, vector<16x1xf32>,
    return
  }
  func.func @transform_0(%arg0: i32) -> (i32, i32) {
    %c0_i32 = arith.constant 0 : i32
    %c0_i32_0 = arith.constant 0 : i32
    return %arg0, %c0_i32 : i32, i32
  }
  func.func @transform_1(%arg0: i32) -> (i32, i32) {
    %c0_i32 = arith.constant 0 : i32
    %c0_i32_0 = arith.constant 0 : i32
    %c0_i32_1 = arith.constant 0 : i32
    return %c0_i32, %c0_i32_0 : i32, i32
  }
  func.func @transform_2(%arg0: i32) -> (i32, i32) {
    %c0_i32 = arith.constant 0 : i32
    %c0_i32_0 = arith.constant 0 : i32
    %c0_i32_1 = arith.constant 0 : i32
    return %c0_i32, %c0_i32_0 : i32, i32
  }
  func.func @transform_3(%arg0: i32) -> (i32, i32) {
    %c0_i32 = arith.constant 0 : i32
    %c0_i32_0 = arith.constant 0 : i32
    %c0_i32_1 = arith.constant 0 : i32
    return %c0_i32, %c0_i32_0 : i32, i32
  }
  func.func @transform_4(%arg0: i32) -> (i32, i32) {
    %c0_i32 = arith.constant 0 : i32
    %c0_i32_0 = arith.constant 0 : i32
    %c0_i32_1 = arith.constant 0 : i32
    return %c0_i32, %c0_i32_0 : i32, i32
  }
  func.func @transform_5(%arg0: i32) -> (i32, i32) {
    %c0_i32 = arith.constant 0 : i32
    %c0_i32_0 = arith.constant 0 : i32
    %c0_i32_1 = arith.constant 0 : i32
    return %c0_i32, %c0_i32_0 : i32, i32
  }
  func.func @transform_6(%arg0: i32) -> i32 {
    %c0_i32 = arith.constant 0 : i32
    %c0_i32_0 = arith.constant 0 : i32
    return %c0_i32 : i32
  }
  func.func @transform_7(%arg0: i32) -> (i32, i32) {
    %c0_i32 = arith.constant 0 : i32
    %c0_i32_0 = arith.constant 0 : i32
    return %arg0, %c0_i32 : i32, i32
  }
}

</mosaic_0001>

<bundles_post_ra>
// kernel: charge_output.1
= control target key start
LH: loop header
LB: loop body
LE: loop exit
PB: predicated region body
PF: predicated region fallthrough
CT: control target
= control target key end

     0   :  { %v282_v0 = vmov 0.0   ;;  %vm283_vm0 = vmmov 0   ;;  %vm58_vm1 = vcmask 261120   ;;  %v201_v35 = vlaneseq  ;;  %s361_s1 = inlined_call_operand.vmem [shape: bf16[32,32], index: 1, kind: input, shape index: {}]   ;;  %s362_s0 = inlined_call_operand.vmem [shape: bf16[16,32], index: 0, kind: input, shape index: {}]   ;;  %s363_s3 = inlined_call_operand.vmem [shape: bf16[32,32], index: 3, kind: input, shape index: {}]   ;;  %s364_s2 = inlined_call_operand.vmem [shape: f32[1,32], index: 2, kind: input, shape index: {}]   ;;  %s365_s4 = inlined_call_operand.vmem [shape: f32[1,32], index: 4, kind: input, shape index: {}]   ;;  %s366_s5 = inlined_call_operand.vmem [shape: bf16[1,32], index: 5, kind: input, shape index: {}]   ;;  %s367_s6 = inlined_call_operand.<no memory space> [shape: f32[1], index: 6, kind: input, shape index: {}]   ;;  %s368_s7 = inlined_call_operand.vmem [shape: f32[16,1], index: 7, kind: output, shape index: {}]  }
   0x1   :  { %243 = vmatprep.subr.bf16.mxu0 %v282_v0  ;;  %v261_v1 = vld [vmem:[%s361_s1 + $0x8] sm:$0xff]   ;;  %247 = vmatprep.mubr.msk.bf16.mxu0 %vm283_vm0, %v282_v0  ;;  %v262_v2 = vld [vmem:[%s361_s1] sm:$0xff]   ;;  %v214_v51 = vstv %s367_s6  ;;  %vm217_vm2 = vcmask 7168  }
   0x2   :  { %251 = vmatprep.subr.bf16.mxu1 %v282_v0  ;;  %255 = vmatprep.mubr.msk.bf16.mxu1 %vm283_vm0, %v282_v0  ;;  %v263_v3 = vld [vmem:[%s362_s0] sm:$0xff]   ;;  %v264_v4 = vld [vmem:[%s363_s3 + $0x8] sm:$0xff]   ;;  %v202_v38 = vshrl.u32 %v201_v35, 7 }
   0x3   :  { %244 = vmatpush3.bf16.msra.mxu0 %v261_v1  ;;  %252 = vmatpush3.bf16.msra.mxu1 %v264_v4  ;;  %v265_v5 = vld [vmem:[%s363_s3] sm:$0xff]  }
   0x4   :  { %245 = vmatprep.subr.bf16.mxu0 %v282_v0  ;;  %253 = vmatprep.subr.bf16.mxu1 %v282_v0  ;;  %v224_v6 = vld [vmem:[%s364_s2] ss:$0 sm:$0xff]  ;;  %v203_v41 = vsub.s32 0, %v202_v38 }
   0x5   :  { %v231_v24 = vld [vmem:[%s365_s4] ss:$0 sm:$0xff] }
   0x6   :  { %v199_v39 = vld [vmem:[%s366_s5] sm:$0x1] }
   0x7   :  { %246 = vmatpush3.bf16.msra.mxu0 %v262_v2  ;;  %254 = vmatpush3.bf16.msra.mxu1 %v265_v5  ;;  %v200_v40 = vunpack.c.l.bf16 %v199_v39 }
   0x9   :  { %v204_v42 = vrot.slane %v200_v40, %v203_v41 }
   0xa   :  { %248 = vmatmul.mubr.msk.bf16.vlgmr.msra.gmra.mxu0 %vm58_vm1, %v263_v3 }
  0xca   :  { %v96_v7 = vpop.f32.mrf.mxu0 }
  0xcb   :  { %v97_v8 = vadd.f32 %v224_v6, %v96_v7 }
  0xcc   :  { %v249_v9 = vpop.f32.mrf.mxu0 }
  0xcd   :  { %v229_v10 = vmul.f32 -1.442695, %v97_v8 }
  0xce   :  { %v99_v11 = vpop.f32.mrf.mxu0 }
  0xcf   :  { %266 = vpow2.f32 %v229_v10  ;;  %v100_v12 = vadd.f32 %v224_v6, %v99_v11 }
  0xd0   :  { %v250_v13 = vpop.f32.mrf.mxu0 }
  0xd1   :  { %v230_v14 = vmul.f32 -1.442695, %v100_v12 }
  0xd3   :  { %268 = vpow2.f32 %v230_v14 }
  0xdc   :  { %v267_v15 = vpop.eup %266 }
  0xdd   :  { %v109_v16 = vadd.f32 1.0, %v267_v15 }
  0xdf   :  { %270 = vrcp.f32 %v109_v16 }
  0xe0   :  { %v269_v17 = vpop.eup %268 }
  0xe1   :  { %v110_v18 = vadd.f32 1.0, %v269_v17 }
  0xe3   :  { %272 = vrcp.f32 %v110_v18 }
  0xec   :  { %v271_v19 = vpop.eup %270 }
  0xed   :  { %v115_v21 = vmul.f32 %v271_v19, %v97_v8 }
  0xf0   :  { %v273_v20 = vpop.eup %272 }
  0xf1   :  { %v116_v22 = vmul.f32 %v273_v20, %v100_v12 }
  0xf3   :  { %v117_v23 = vpack.c.bf16 %v116_v22, %v115_v21 }
  0xf5   :  { %256 = vmatmul.mubr.msk.bf16.vlgmr.msra.gmra.mxu1 %vm58_vm1, %v117_v23 }
 0x1b5   :  { %v178_v25 = vpop.f32.mrf.mxu1 }
 0x1b6   :  { %v179_v26 = vadd.f32 %v231_v24, %v178_v25 }
 0x1b7   :  { %v257_v27 = vpop.f32.mrf.mxu1 }
 0x1b8   :  { %v235_v28 = vmul.f32 -1.442695, %v179_v26 }
 0x1b9   :  { %v181_v29 = vpop.f32.mrf.mxu1 }
 0x1ba   :  { %274 = vpow2.f32 %v235_v28  ;;  %v182_v30 = vadd.f32 %v231_v24, %v181_v29 }
 0x1bb   :  { %v258_v31 = vpop.f32.mrf.mxu1 }
 0x1bc   :  { %v236_v32 = vmul.f32 -1.442695, %v182_v30 }
 0x1be   :  { %276 = vpow2.f32 %v236_v32 }
 0x1c7   :  { %v275_v33 = vpop.eup %274 }
 0x1c8   :  { %v191_v34 = vadd.f32 1.0, %v275_v33 }
 0x1ca   :  { %278 = vrcp.f32 %v191_v34 }
 0x1cb   :  { %v277_v36 = vpop.eup %276 }
 0x1cc   :  { %v192_v37 = vadd.f32 1.0, %v277_v36 }
 0x1ce   :  { %280 = vrcp.f32 %v192_v37 }
 0x1d7   :  { %v279_v43 = vpop.eup %278 }
 0x1d8   :  { %v197_v44 = vmul.f32 %v279_v43, %v179_v26 }
 0x1da   :  { %v205_v45 = vmul.f32 %v204_v42, %v197_v44 }
 0x1db   :  { %v281_v46 = vpop.eup %280 }
 0x1dc   :  { %v198_v47 = vmul.f32 %v281_v46, %v182_v30  ;;  %v207_v48 = vsel %vm58_vm1, %v205_v45, 0.0 }
 0x1dd   :  { %208 = vadd.xlane.f32.xlu0 %v207_v48 }
 0x1de   :  { %v206_v49 = vmul.f32 %v204_v42, %v198_v47 }
 0x1e0   :  { %v210_v50 = vsel %vm58_vm1, %v206_v49, 0.0 }
 0x1e1   :  { %211 = vadd.xlane.f32.xlu0 %v210_v50 }
 0x266   :  { %v209_v52 = vpop.xlane.xlu0 %208 }
 0x267   :  { %v215_v53 = vadd.f32 %v214_v51, %v209_v52 }
 0x269   :  { %218 = vst.msk [vmem:[%s368_s7] sm:$0xff] %vm217_vm2, %v215_v53 }
 0x26a   :  { %v212_v54 = vpop.xlane.xlu0 %211 }
 0x26b   :  { %v216_v55 = vadd.f32 %v214_v51, %v212_v54 }
 0x26d   :  { %219 = vst.msk [vmem:[%s368_s7 + $0x8] sm:$0xff] %vm217_vm2, %v216_v55 }

</bundles_post_ra>
